<compile_context>
chip_gen: v7x
topology: tpu7x:2x2x1
jax: 0.10.0
libtpu: 0.0.40
codegen_flags: <defaults>
</compile_context>

<pallas_src>
import functools
import math

import numpy as np
import jax
import jax.numpy as jnp
from jax.experimental import pallas as pl
from jax.experimental.pallas import tpu as pltpu


# ---------------------------------------------------------------------------
# Host-side construction of the 1-D interpolation operators (PyTorch semantics)
# ---------------------------------------------------------------------------
def _interp_matrix_1d(in_size, out_size, mode):
    """Operator U (out_size, in_size) s.t. out = U @ in reproduces F.interpolate
    along one axis (align_corners=False for the linear modes, legacy nearest)."""
    U = np.zeros((out_size, in_size), dtype=np.float32)
    if mode == "nearest":
        for d in range(out_size):
            s = min(int(math.floor(d * in_size / out_size)), in_size - 1)
            U[d, s] = 1.0
    elif mode in ("bilinear", "linear"):
        scale = in_size / out_size
        for d in range(out_size):
            src = (d + 0.5) * scale - 0.5          # half-pixel centers
            src = max(src, 0.0)                    # PyTorch clamps to 0
            i0 = min(int(math.floor(src)), in_size - 1)
            i1 = min(i0 + 1, in_size - 1)
            frac = src - i0
            U[d, i0] += 1.0 - frac
            U[d, i1] += frac
    else:
        raise NotImplementedError(f"mode={mode!r} not supported")
    return U


@functools.lru_cache(maxsize=None)
def _separable_weights(h, w, ho, wo, mode):
    """Device-resident (H, Ho) and (W, Wo) f32 operators.  lru_cache holds the
    device arrays so repeated eager calls do not re-upload them host->HBM."""
    uy = _interp_matrix_1d(h, ho, mode)                # (Ho, H)
    ux = _interp_matrix_1d(w, wo, mode)                # (Wo, W)
    return (jnp.asarray(np.ascontiguousarray(uy.T)),   # Uy^T: (H, Ho)
            jnp.asarray(np.ascontiguousarray(ux.T)))   # Ux^T: (W, Wo)


# ---------------------------------------------------------------------------
# Fused separable two-pass Pallas kernel
# ---------------------------------------------------------------------------
def _interp_separable_kernel(x_ref, uyt_ref, uxt_ref, o_ref):
    # x_ref: (TM, H, W)   uyt_ref: (H, Ho)   uxt_ref: (W, Wo)   o_ref: (TM, Ho, Wo)
    tm, h, w = x_ref.shape
    ho = uyt_ref.shape[1]
    wo = uxt_ref.shape[1]

    # Height pass (contract H).  Transpose the small pre-expansion tile so the
    # contraction dim is minor, then one big 2-D MXU matmul with M = TM*W.
    xt = jnp.swapaxes(x_ref[...], 1, 2)                       # (TM, W, H)  XLU
    s = jnp.dot(xt.reshape(tm * w, h), uyt_ref[...],
                preferred_element_type=jnp.float32)           # (TM*W, Ho)

    # Width pass (contract W).  M = TM*Ho.
    st = jnp.swapaxes(s.reshape(tm, w, ho), 1, 2)             # (TM, Ho, W)  XLU
    o = jnp.dot(st.reshape(tm * ho, w), uxt_ref[...],
                preferred_element_type=jnp.float32)           # (TM*Ho, Wo)

    o_ref[...] = o.reshape(tm, ho, wo).astype(o_ref.dtype)


def _choose_row_tile(nc, h, w, ho, wo):
    """Row tile over the collapsed N*C axis for one grid step."""
    # Rough per-row f32 footprint: double-buffered input block, double-buffered
    # output block, plus in-kernel intermediates.  Stay well inside the default
    # scoped VMEM (16 MiB on v5e, 32 MiB on v6e/v7x; v7x physical is 64 MiB).
    bytes_per_row = 4 * (2 * h * w + 2 * w * ho + 3 * ho * wo)
    budget = 16 * 1024 * 1024
    cap = max(1, min(256, budget // max(bytes_per_row, 1)))
    tm = min(nc, cap)
    while nc % tm:                   # largest divisor of nc not exceeding cap
        tm -= 1
    # Keep >= 2 "parallel" grid steps when possible (megacore balance on v7x).
    if nc // tm < 2 and tm % 2 == 0:
        tm //= 2
    return tm


@functools.partial(jax.jit, static_argnames=("scale", "mode"))
def interpolate_nchw(x, *, scale, mode):
    """F.interpolate(x, scale_factor=scale, mode=mode, align_corners=False)
    for NCHW float inputs, as a single fused Pallas TPU kernel."""
    N, C, H, W = x.shape
    Ho = int(math.floor(H * scale))
    Wo = int(math.floor(W * scale))

    uyt, uxt = _separable_weights(H, W, Ho, Wo, mode)   # (H, Ho), (W, Wo) f32

    nc = N * C
    tm = _choose_row_tile(nc, H, W, Ho, Wo)
    x3 = x.reshape(nc, H, W).astype(jnp.float32)        # free reshape of NCHW

    out = pl.pallas_call(
        _interp_separable_kernel,
        out_shape=jax.ShapeDtypeStruct((nc, Ho, Wo), jnp.float32),
        grid=(nc // tm,),
        in_specs=[
            pl.BlockSpec((tm, H, W), lambda i: (i, 0, 0)),
            # Constant 1-D interpolation weights (~4 KB total); constant index
            # maps keep them VMEM-resident across grid steps.
            pl.BlockSpec((H, Ho), lambda i: (0, 0)),
            pl.BlockSpec((W, Wo), lambda i: (0, 0)),
        ],
        out_specs=pl.BlockSpec((tm, Ho, Wo), lambda i: (i, 0, 0)),
        compiler_params=pltpu.CompilerParams(
            dimension_semantics=("parallel",),          # shard row tiles across TCs
        ),
    )(x3, uyt, uxt)
    return out.reshape(N, C, Ho, Wo).astype(x.dtype)


class Interpolate:
    """Mirror of the PyTorch module: Interpolate(scale, mode)."""

    def __init__(self, scale, mode):
        self.scale = scale
        self.mode = mode

    def __call__(self, x):
        return interpolate_nchw(x, scale=self.scale, mode=self.mode)


# ---------------------------------------------------------------------------
# Example run + independent correctness check
# ---------------------------------------------------------------------------
if __name__ == "__main__":
    key = jax.random.PRNGKey(0)
    # NCHW, matching the PyTorch module's expected input layout.
    x = jax.random.normal(key, (2, 4, 16, 16), jnp.float32)
    N, C, H, W = x.shape

    for scale, mode in [(2, "bilinear"), (2, "nearest")]:
        mod = Interpolate(scale, mode)
        y = jax.block_until_ready(mod(x))

        Ho, Wo = int(H * scale), int(W * scale)
        assert y.shape == (N, C, Ho, Wo)
        assert bool(jnp.isfinite(y).all())

        # Independent reference (not built from the kernel's own weight
        # matrices): for integer upscale factors, jax.image.resize (half-pixel
        # centers + edge renormalization, floor-rule nearest) matches
        # F.interpolate(..., align_corners=False) / legacy 'nearest' exactly.
        ref = jax.image.resize(x, (N, C, Ho, Wo), method=mode)
        assert bool(jnp.allclose(y, ref, atol=1e-4, rtol=1e-4))

    print("KERNEL_OK")
</pallas_src>

<mosaic_0001>
module attributes {stable_mosaic.version = 11 : i64} {
  func.func @_interp_separable_kernel(%arg0: i32, %arg1: memref<4x16x16xf32, #tpu.memory_space<vmem>>, %arg2: memref<16x32xf32, #tpu.memory_space<vmem>>, %arg3: memref<16x32xf32, #tpu.memory_space<vmem>>, %arg4: memref<4x32x32xf32, #tpu.memory_space<vmem>>) attributes {dimension_semantics = [#tpu.dimension_semantics<parallel>], iteration_bounds = array<i64: 2>, scalar_prefetch = 0 : i64, scratch_operands = 0 : i64, tpu.core_type = #tpu.core_type<tc>, window_params = [{transform_indices = @transform_0, window_bounds = array<i64: 4, 16, 16>}, {pipeline_mode = #tpu.pipeline_mode<synchronous>, transform_indices = @transform_1, window_bounds = array<i64: 16, 32>}, {pipeline_mode = #tpu.pipeline_mode<synchronous>, transform_indices = @transform_2, window_bounds = array<i64: 16, 32>}, {transform_indices = @transform_3, window_bounds = array<i64: 4, 32, 32>}]} {
    %c0 = arith.constant 0 : index
    %c0_0 = arith.constant 0 : index
    %c0_1 = arith.constant 0 : index
    %0 = vector.load %arg1[%c0, %c0_0, %c0_1] : memref<4x16x16xf32, #tpu.memory_space<vmem>>, vector<4x16x16xf32>
    %1 = tpu.transpose %0, [0, 2, 1] : vector<4x16x16xf32> -> vector<4x16x16xf32>
    %2 = vector.shape_cast %1 : vector<4x16x16xf32> to vector<64x16xf32>
    %c0_2 = arith.constant 0 : index
    %c0_3 = arith.constant 0 : index
    %3 = vector.load %arg2[%c0_2, %c0_3] : memref<16x32xf32, #tpu.memory_space<vmem>>, vector<16x32xf32>
    %cst = arith.constant dense<0.000000e+00> : vector<64x32xf32>
    %4 = tpu.matmul %2, %3, %cst {dimension_numbers = #tpu.dot_dimension_numbers<[1], [0], [0], [1], [0, 0, 1, 1], [], []>} : vector<64x16xf32>, vector<16x32xf32>, vector<64x32xf32> -> vector<64x32xf32>
    %5 = vector.shape_cast %4 : vector<64x32xf32> to vector<4x16x32xf32>
    %6 = tpu.transpose %5, [0, 2, 1] : vector<4x16x32xf32> -> vector<4x32x16xf32>
    %7 = vector.shape_cast %6 : vector<4x32x16xf32> to vector<128x16xf32>
    %c0_4 = arith.constant 0 : index
    %c0_5 = arith.constant 0 : index
    %8 = vector.load %arg3[%c0_4, %c0_5] : memref<16x32xf32, #tpu.memory_space<vmem>>, vector<16x32xf32>
    %cst_6 = arith.constant dense<0.000000e+00> : vector<128x32xf32>
    %9 = tpu.matmul %7, %8, %cst_6 {dimension_numbers = #tpu.dot_dimension_numbers<[1], [0], [0], [1], [0, 0, 1, 1], [], []>} : vector<128x16xf32>, vector<16x32xf32>, vector<128x32xf32> -> vector<128x32xf32>
    %10 = vector.shape_cast %9 : vector<128x32xf32> to vector<4x32x32xf32>
    %c0_7 = arith.constant 0 : index
    %c0_8 = arith.constant 0 : index
    %c0_9 = arith.constant 0 : index
    %11 = vector.load %arg4[%c0_7, %c0_8, %c0_9] : memref<4x32x32xf32, #tpu.memory_space<vmem>>, vector<4x32x32xf32>
    tpu.vector_store %arg4[%c0_7, %c0_8, %c0_9], %10 {strides = array<i32>} : memref<4x32x32xf32, #tpu.memory_space<vmem>>, vector<4x32x32xf32>,
    return
  }
  func.func @transform_0(%arg0: i32) -> (i32, i32, i32) {
    %c0_i32 = arith.constant 0 : i32
    %c0_i32_0 = arith.constant 0 : i32
    %c0_i32_1 = arith.constant 0 : i32
    return %arg0, %c0_i32, %c0_i32_0 : i32, i32, i32
  }
  func.func @transform_1(%arg0: i32) -> (i32, i32) {
    %c0_i32 = arith.constant 0 : i32
    %c0_i32_0 = arith.constant 0 : i32
    %c0_i32_1 = arith.constant 0 : i32
    return %c0_i32, %c0_i32_0 : i32, i32
  }
  func.func @transform_2(%arg0: i32) -> (i32, i32) {
    %c0_i32 = arith.constant 0 : i32
    %c0_i32_0 = arith.constant 0 : i32
    %c0_i32_1 = arith.constant 0 : i32
    return %c0_i32, %c0_i32_0 : i32, i32
  }
  func.func @transform_3(%arg0: i32) -> (i32, i32, i32) {
    %c0_i32 = arith.constant 0 : i32
    %c0_i32_0 = arith.constant 0 : i32
    %c0_i32_1 = arith.constant 0 : i32
    return %arg0, %c0_i32, %c0_i32_0 : i32, i32, i32
  }
}

</mosaic_0001>

<bundles_post_ra>
// kernel: interpolate_nchw.1
= control target key start
LH: loop header
LB: loop body
LE: loop exit
PB: predicated region body
PF: predicated region fallthrough
CT: control target
= control target key end

     0   :  { %8 = vsyncpa [#allocation3], 0  ;;  %s1627_s0 = inlined_call_operand.hbm [shape: f32[8,16,16], index: 0, kind: input, shape index: {}]   ;;  %s1628_s1 = inlined_call_operand.hbm [shape: f32[16,32], index: 1, kind: input, shape index: {}, may-alias: {1,2}]   ;;  %s1629_s2 = inlined_call_operand.hbm [shape: f32[16,32], index: 2, kind: input, shape index: {}, may-alias: {1,2}]   ;;  %s1630_s3 = inlined_call_operand.hbm [shape: f32[8,32,32], index: 3, kind: output, shape index: {}]  }
   0x1   :  { %10 = vsyncpa [#allocation3 + $0x1], 0 }
   0x2   :  { %11 = vsyncpa [#allocation6], 0 }
   0x3   :  { %12 = vsyncpa [#allocation4], 0 }
   0x4   :  { %14 = vsyncpa [#allocation4 + $0x1], 0  ;;  %s1324_s12 = smov 0   ;;  %s1326_s13 = smov 0  }
   0x5   :  { %s1328_s14 = smov 0   ;;  %s1330_s15 = smov 0  }
   0x6 LB: > { %s1345_s16 = sadd.s32 4294967295, %s1294_s15   ;;  %s936_s17 = sadd.s32 4294967294, %s1294_s15   ;;  %s1294_s15 = sphi %s1330_s15, %s1650_s15   ;;  %s1290_s14 = sphi %s1328_s14, %s1649_s14   ;;  %s1286_s13 = sphi %s1326_s13, %s1648_s13   ;;  %s1282_s12 = sphi %s1324_s12, %s1647_s12  }
   0x7   : > { %p40_p0 = scmp.ne.s32.totalorder %s1286_s13, %s1282_s12  ;;  %p1631_p1 = scmp.eq.s32.totalorder %s1345_s16, 0 }
   0x8   : > { %p112_p3 = scmp.eq.s32.totalorder %s936_s17, 1  ;;  %p937_p5 = scmp.ge.s32.totalorder %s1294_s15, 1 }
   0x9   : > { %p1354_p4 = por %p1631_p1, %p40_p0  ;;  %p119_p7 = scmp.lt.s32.totalorder %s1294_s15, 3 }
   0xa   : > { %p1359_p6 = por %p112_p3, %p40_p0  ;;  %s1296_s21 = smov [#allocation5]  }
   0xb   : > { %s1634_s18 = scalar_select %p1354_p4, 1, 0 }
   0xc   : > { %s1635_s19 = scalar_select %p1359_p6, 1, 0 }
   0xd   : > { %p1364_p8 = pnand %p937_p5, %p119_p7  ;;  %s131_s22 = sshll.u32 %s1296_s21, 4  ;;  %s1368_s22 = int_to_ptr.vmem [resolvable:$true] %s131_s22 }
   0xe   : > { %s1297_s24 = smov [#allocation7]   ;;  %s1138_s28 = scalar_lea.hbm %s1628_s1, 256 }
   0xf   : > { %p1078_p9 = pneg %p1364_p8  ;;  %s144_s25 = sshll.u32 %s1297_s24, 4  ;;  %s1379_s25 = int_to_ptr.vmem [resolvable:$true] %s144_s25 }
  0x10   : > { %p1139_p12 = scmp.ne.s32.totalorder %s1628_s1, %s1138_s28  ;;  %p1145_p5 = scmp.lt.u32.totalorder %s1138_s28, %s1628_s1 }
  0x11   : > { %p1375_p11 = pnand %p1078_p9, %p1631_p1 }
  0x13   : > { %p1140_p13 = pneg %p1375_p11 }
  0x15   : > { %p1141_p0 = pnand %p1140_p13, %p1139_p12 }
  0x17   : > { %p1142_p3 = pneg %p1141_p0 }
  0x19   : > { %p1147_p7 = pnand %p1145_p5, %p1142_p3 }
  0x1b   : > { %1150 = shalt.err (!%p1147_p7)
}
  0x1c   : > { %s1151_s6 = scalar_lea.vmem %s1368_s22, 256  ;;  %p1159_p2 = scmp.lt.s32.totalorder %s1368_s22, %s1368_s22 }
  0x1d   : > { %p1152_p9 = scmp.ne.s32.totalorder %s1368_s22, %s1151_s6  ;;  %p1160_p12 = scmp.lt.s32.totalorder %s1151_s6, %s1151_s6 }
  0x1f   : > { %p1154_p10 = pnand %p1152_p9, %p1140_p13  ;;  %p1161_p0 = por %p1160_p12, %p1159_p2 }
  0x21   : > { %p1155_p1 = pneg %p1154_p10 }
  0x23   : > { %p1162_p6 = pnand %p1161_p0, %p1155_p1 }
  0x25   : > { %1165 = shalt.err (!%p1162_p6)
}
  0x26   : > { %s1298_s7 = smov 128   ;;  %s1299_s8 = smov 8  }
  0x27   : > { %1081 = dma.hbm_to_vmem [thread:$0]  (!%p1375_p11), %s1628_s1, 256, %s1368_s22, [#allocation6], %s1298_s7, %s1298_s7, %s1299_s8  }
  0x28   : > { %s1166_s21 = scalar_lea.hbm %s1629_s2, 256 }
  0x29   : > { %p1167_p1 = scmp.ne.s32.totalorder %s1629_s2, %s1166_s21  ;;  %p1173_p10 = scmp.lt.u32.totalorder %s1166_s21, %s1629_s2 }
  0x2b   : > { %p1169_p2 = pnand %p1167_p1, %p1140_p13 }
  0x2d   : > { %p1170_p6 = pneg %p1169_p2 }
  0x2f   : > { %p1175_p3 = pnand %p1173_p10, %p1170_p6 }
  0x31   : > { %1178 = shalt.err (!%p1175_p3)
}
  0x32   : > { %s1179_s22 = scalar_lea.vmem %s1379_s25, 256  ;;  %p1187_p12 = scmp.lt.s32.totalorder %s1379_s25, %s1379_s25 }
  0x33   : > { %p1180_p5 = scmp.ne.s32.totalorder %s1379_s25, %s1179_s22  ;;  %p1188_p0 = scmp.lt.s32.totalorder %s1179_s22, %s1179_s22 }
  0x35   : > { %p1182_p7 = pnand %p1180_p5, %p1140_p13  ;;  %p1189_p1 = por %p1188_p0, %p1187_p12 }
  0x37   : > { %p1183_p9 = pneg %p1182_p7 }
  0x39   : > { %p1190_p2 = pnand %p1189_p1, %p1183_p9 }
  0x3b   : > { %1193 = shalt.err (!%p1190_p2)
}
  0x3c   : > { %1084 = dma.hbm_to_vmem [thread:$0]  (!%p1375_p11), %s1629_s2, 256, %s1379_s25, [#allocation6], %s1298_s7, %s1298_s7, %s1299_s8  }
  0x3d   : > { %s1440_s23 = sadd.s32 1, %s1294_s15   ;;  %s27_s4 = sadd.s32 1, %s1290_s14 }
  0x3e   : > { %s24_s5 = ssub.s32 %s1294_s15, %s1440_s23  ;;  %p34_p13 = scmp.ne.s32.totalorder %s1290_s14, %s1286_s13 }
  0x3f   : > { %p25_p6 = scmp.eq.s32.totalorder %s24_s5, 0  ;;  %p35_p10 = scmp.eq.s32.totalorder %s1294_s15, 0 }
  0x40   : > { %p1638_p3 = scmp.eq.s32.totalorder %s1345_s16, 1  ;;  %p1095_p7 = scmp.lt.s32.totalorder %s1294_s15, 2 }
  0x41   : > { %s1456_s9 = scalar_select %p25_p6, %s1290_s14, %s27_s4  }
  0x42   : > { %p1450_p5 = por %p1638_p3, %p34_p13  ;;  %p36_p9 = por %p35_p10, %p34_p13 }
  0x43   : > { %s158_s10 = sand.u32 1, %s1290_s14   ;;  %s981_s25 = sshll.u32 %s1294_s15, 10 }
  0x44   : > { %s1639_s6 = scalar_select %p1450_p5, 1, 0 }
  0x45   : > { %s941_s11 = sshll.u32 %s158_s10, 6  ;;  %s1463_s24 = scalar_lea.hbm %s1627_s0, %s981_s25 }
  0x46   : > { %s162_s26 = scalar_lea.vmem [#allocation2], %s941_s11  ;;  %p1467_p11 = pnand %p1095_p7, %p36_p9 }
  0x47   : > { %s170_s27 = sshll.u32 %s162_s26, 4  ;;  %s1471_s22 = scalar_lea.sflag [#allocation3], %s158_s10  ;;  %s1465_s27 = int_to_ptr.vmem [resolvable:$true] %s170_s27 }
  0x48   : > { %s1194_s29 = scalar_lea.hbm %s1463_s24, 1024  ;;  %p1196_p0 = pneg %p1467_p11 }
  0x49   : > { %p1195_p12 = scmp.ne.s32.totalorder %s1463_s24, %s1194_s29  ;;  %s1199_s5 = scalar_lea.hbm %s1627_s0, 2048 }
  0x4a   : > { %p1200_p13 = scmp.lt.u32.totalorder %s1463_s24, %s1627_s0  ;;  %p1201_p6 = scmp.lt.u32.totalorder %s1199_s5, %s1194_s29 }
  0x4b   : > { %p1197_p1 = pnand %p1196_p0, %p1195_p12  ;;  %p1203_p3 = scmp.lt.u32.totalorder %s1194_s29, %s1463_s24 }
  0x4c   : > { %p1202_p10 = por %p1201_p6, %p1200_p13 }
  0x4d   : > { %p1198_p2 = pneg %p1197_p1 }
  0x4e   : > { %p1204_p7 = por %p1203_p3, %p1202_p10 }
  0x50   : > { %p1205_p9 = pnand %p1204_p7, %p1198_p2 }
  0x52   : > { %1208 = shalt.err (!%p1205_p9)
}
  0x53   : > { %s1209_s10 = scalar_lea.vmem %s1465_s27, 1024  ;;  %s1300_s17 = smov [#allocation2]  }
  0x54   : > { %p1210_p12 = scmp.ne.s32.totalorder %s1465_s27, %s1209_s10  ;;  %s1214_s21 = sshll.u32 %s1300_s17, 4  ;;  %s1215_s21 = int_to_ptr.vmem [resolvable:$false] %s1214_s21 }
  0x55   : > { %s1216_s26 = scalar_lea.vmem %s1215_s21, 2048  ;;  %p1217_p4 = scmp.lt.s32.totalorder %s1465_s27, %s1215_s21 }
  0x56   : > { %p1212_p1 = pnand %p1210_p12, %p1196_p0  ;;  %p1218_p13 = scmp.lt.s32.totalorder %s1216_s26, %s1209_s10 }
  0x58   : > { %p1213_p5 = pneg %p1212_p1  ;;  %p1219_p6 = por %p1218_p13, %p1217_p4 }
  0x5a   : > { %p1220_p10 = pnand %p1219_p6, %p1213_p5 }
  0x5c   : > { %1223 = shalt.err (!%p1220_p10)
}
  0x5d   : > { %1088 = dma.hbm_to_vmem [thread:$0]  (!%p1467_p11), %s1463_s24, 1024, %s1465_s27, %s1471_s22, %s1298_s7, %s1298_s7, %s1299_s8  }
  0x5e   : > { %182 = sbr.rel (%p1364_p8) target bundleno = 845 (0x34d), region = 32  ;;  %s1505_s29 = sand.u32 (!%p1364_p8), 1, %s1286_s13  }
  0x5f   : > { %s946_s30 = sshll.u32 (!%p1364_p8), %s1505_s29, 6  ;;  %s185_s4 = scalar_lea.sflag (!%p1364_p8), [#allocation3], %s1505_s29 }
  0x60   : > { %s188_s5 = scalar_lea.vmem (!%p1364_p8), [#allocation2], %s946_s30  ;;  %p1641_p4 = scmp.ne.s32.totalorder (!%p1364_p8), %s1634_s18, 0 }
  0x65   : > { %1269 = dma.done.wait (%p1641_p4), %s185_s4, 1024  }
  0x66   : > { %1271 = vsyncadd (%p1641_p4), %s185_s4, 4294966272  ;;  %p1642_p5 = scmp.eq.s32.totalorder %s1345_s16, 0 }
  0x68   : > { %1273 = dma.done.wait (%p1642_p5), [#allocation6], 512   ;;  %p1643_p11 = pmov %p1642_p5 }
  0x69   : > { %v221_v0 = vld [vmem:[%s188_s5] sm:$0xff]  ;;  %v223_v1 = vld [vmem:[%s188_s5 + $0x10] sm:$0xff]  ;;  %v222_v2 = vld [vmem:[%s188_s5 + $0x8] sm:$0xff]  ;;  %vm359_vm0 = vcmask 130048   ;;  %s949_s18 = sshll.u32 %s1505_s29, 7  ;;  %vm812_vm1 = vcmask 261120  }
  0x6a   : > { %1275 = vsyncadd (%p1643_p11), [#allocation6], 4294966784  ;;  %229 = vxpose.xlu0.b32.start [1/2] (short) (narrow) %v221_v0, 16  ;;  %261 = vxpose.xlu1.b32.start [1/2] (short) (narrow) %v223_v1, 16  ;;  %v224_v3 = vld [vmem:[%s188_s5 + $0x18] sm:$0xff]  ;;  %v357_v4 = vld [vmem:[#allocation5] sm:$0xff] }
  0x6b   : > { %v358_v5 = vld [vmem:[#allocation5 + $0x8] sm:$0xff]  ;;  %v225_v7 = vld [vmem:[%s188_s5 + $0x20] sm:$0xff]  ;;  %v227_v8 = vld [vmem:[%s188_s5 + $0x30] sm:$0xff]  ;;  %s1542_s20 = scalar_lea.vmem [#allocation8], %s949_s18  ;;  %s983_s7 = sshll.u32 %s1345_s16, 11 }
  0x6c   : > { %v1056_v6 = vpack.c.bf16 %v358_v5, %v357_v4  ;;  %v226_v9 = vld [vmem:[%s188_s5 + $0x28] sm:$0xff]  ;;  %v228_v10 = vld [vmem:[%s188_s5 + $0x38] sm:$0xff]  ;;  %v617_v23 = vld [vmem:[#allocation7] sm:$0xff]  ;;  %s844_s8 = sshll.u32 %s1542_s20, 4  ;;  %s1577_s28 = scalar_lea.hbm %s1630_s3, %s983_s7  ;;  %s1579_s8 = int_to_ptr.vmem [resolvable:$true] %s844_s8 }
  0x6d   : > { %v618_v24 = vld [vmem:[#allocation7 + $0x8] sm:$0xff]  ;;  %s830_s16 = scalar_lea.sflag [#allocation4], %s1505_s29  ;;  %s1224_s22 = scalar_lea.vmem %s1579_s8, 2048 }
  0x6e   : > { %230 = vxpose.xlu0.b32.end [2/2] (short) (narrow) %v222_v2, 16  ;;  %262 = vxpose.xlu1.b32.end [2/2] (short) (narrow) %v224_v3, 16  ;;  %v1060_v25 = vpack.c.bf16 %v618_v24, %v617_v23  ;;  %p1225_p8 = scmp.ne.s32.totalorder %s1579_s8, %s1224_s22  ;;  %p1644_p0 = scmp.ne.s32.totalorder %s1639_s6, 0 }
  0x6f   : > { %1057 = vmatprep.subr.bf16.mxu0 %v1056_v6  ;;  %s1301_s11 = smov [#allocation8]  }
  0x70   : > { %1059 = vmatpush3.bf16.msra.mxu0 %v1056_v6  ;;  %1064 = vmatprep.subr.bf16.mxu1 %v1060_v25  ;;  %p1226_p2 = pnand %p1225_p8, %p1644_p0  ;;  %s1228_s25 = sshll.u32 %s1301_s11, 4  ;;  %s1229_s25 = int_to_ptr.vmem [resolvable:$false] %s1228_s25 }
  0x71   : > { %1061 = vmatprep.subr.bf16.mxu0 %v1060_v25  ;;  %1065 = vmatpush3.bf16.msra.mxu1 %v1060_v25  ;;  %s1230_s10 = scalar_lea.vmem %s1229_s25, 4096  ;;  %p1231_p7 = scmp.lt.s32.totalorder %s1579_s8, %s1229_s25 }
  0x72   : > { %293 = vxpose.xlu0.b32.start [1/2] (short) (narrow) %v225_v7, 16  ;;  %325 = vxpose.xlu1.b32.start [1/2] (short) (narrow) %v227_v8, 16  ;;  %p1227_p3 = pneg %p1226_p2  ;;  %p1232_p9 = scmp.lt.s32.totalorder %s1230_s10, %s1224_s22 }
  0x74   : > { %p1233_p12 = por %p1232_p9, %p1231_p7 }
  0x76   : > { %294 = vxpose.xlu0.b32.end [2/2] (short) (narrow) %v226_v9, 16  ;;  %326 = vxpose.xlu1.b32.end [2/2] (short) (narrow) %v228_v10, 16  ;;  %p1234_p1 = pnand %p1233_p12, %p1227_p3 }
  0xea   : > { %v245_v11 = vpop.trf.xlu0  ;;  %v277_v12 = vpop.trf.xlu1 }
  0xeb   : > { %1016 = vmatprep.mubr.msk.f32.mxu0 %vm359_vm0, %v245_v11 }
  0xee   : > { %v246_v13 = vpop.trf.xlu0  ;;  %v278_v14 = vpop.trf.xlu1 }
  0xef   : > { %1017 = vmatmul.mubr.msk.f32.vlgmr.msra.gmra.mrb[0].mxu0 %vm359_vm0, %v246_v13 }
  0xf0   : > { %1019 = vmatprep.mubr.msk.f32.mxu0 %vm359_vm0, %v277_v12  ;;  %1063 = vmatpush3.bf16.msra.mxu0 %v1060_v25 }
  0xf2   : > { %v309_v15 = vpop.trf.xlu0  ;;  %v341_v16 = vpop.trf.xlu1 }
  0xf3   : > { %1020 = vmatmul.mubr.msk.f32.gmra.mrb[2].mxu0 %vm359_vm0, %v278_v14 }
  0xf4   : > { %1022 = vmatprep.mubr.msk.f32.mxu0 %vm359_vm0, %v309_v15 }
  0xf6   : > { %v310_v17 = vpop.trf.xlu0  ;;  %v342_v18 = vpop.trf.xlu1 }
  0xf7   : > { %1023 = vmatmul.mubr.msk.f32.gmra.mrb[4].mxu0 %vm359_vm0, %v310_v17 }
  0xf8   : > { %1025 = vmatprep.mubr.msk.f32.mxu0 %vm359_vm0, %v341_v16 }
  0xfb   : > { %1026 = vmatmul.mubr.msk.f32.gmra.mrb[6].mxu0 %vm359_vm0, %v342_v18 }
 0x1c2   : > { %v1018_v19 = vpop.f32.mrb[0].mxu0 }
 0x1c3   : > { %v450_v20 = vpop.f32.mrb[1].mxu0 }
 0x1c6   : > { %v1021_v21 = vpop.f32.mrb[2].mxu0 }
 0x1c7   : > { %v460_v22 = vpop.f32.mrb[3].mxu0 }
 0x1c8   : > { %521 = vxpose.xlu0.b32.start [1/2] (short) (narrow) %v460_v22, 32 }
 0x1ca   : > { %v1024_v26 = vpop.f32.mrb[4].mxu0 }
 0x1cb   : > { %v470_v27 = vpop.f32.mrb[5].mxu0 }
 0x1cc   : > { %522 = vxpose.xlu0.b32.end [2/2] (short) (narrow) %v1021_v21, 32  ;;  %553 = vxpose.xlu1.b32.start [1/2] (short) (narrow) %v470_v27, 32 }
 0x1ce   : > { %v1027_v28 = vpop.f32.mrb[6].mxu0 }
 0x1cf   : > { %v480_v29 = vpop.f32.mrb[7].mxu0 }
 0x1d0   : > { %554 = vxpose.xlu1.b32.end [2/2] (short) (narrow) %v1024_v26, 32 }
 0x1d5   : > { %489 = vxpose.xlu0.b32.start [1/2] (short) (narrow) %v450_v20, 32 }
 0x1d9   : > { %490 = vxpose.xlu0.b32.end [2/2] (short) (narrow) %v1018_v19, 32  ;;  %585 = vxpose.xlu1.b32.start [1/2] (short) (narrow) %v480_v29, 32 }
 0x1dd   : > { %586 = vxpose.xlu1.b32.end [2/2] (short) (narrow) %v1027_v28, 32 }
 0x248   : > { %v537_v30 = vpop.trf.xlu0 }
 0x249   : > { %1038 = vmatprep.mubr.msk.f32.mxu1 %vm359_vm0, %v537_v30 }
 0x24c   : > { %v569_v31 = vpop.trf.xlu1  ;;  %v538_v32 = vpop.trf.xlu0 }
 0x24d   : > { %1039 = vmatmul.mubr.msk.f32.vlgmr.msra.gmra.mrb[0].mxu1 %vm359_vm0, %v538_v32 }
 0x250   : > { %v570_v33 = vpop.trf.xlu1  ;;  %v539_v34 = vpop.trf.xlu0 }
 0x251   : > { %1041 = vmatprep.mubr.msk.f32.mxu1 %vm359_vm0, %v539_v34 }
 0x254   : > { %v571_v35 = vpop.trf.xlu1  ;;  %v540_v36 = vpop.trf.xlu0 }
 0x255   : > { %1042 = vmatmul.mubr.msk.f32.gmra.mrb[2].mxu1 %vm359_vm0, %v540_v36 }
 0x256   : > { %1044 = vmatprep.mubr.msk.f32.mxu1 %vm359_vm0, %v569_v31 }
 0x258   : > { %v572_v37 = vpop.trf.xlu1  ;;  %v505_v38 = vpop.trf.xlu0 }
 0x259   : > { %1045 = vmatmul.mubr.msk.f32.gmra.mrb[4].mxu1 %vm359_vm0, %v570_v33  ;;  %1032 = vmatprep.mubr.msk.f32.mxu0 %vm359_vm0, %v505_v38 }
 0x25a   : > { %1047 = vmatprep.mubr.msk.f32.mxu1 %vm359_vm0, %v571_v35 }
 0x25c   : > { %v601_v39 = vpop.trf.xlu1  ;;  %v506_v40 = vpop.trf.xlu0 }
 0x25d   : > { %1048 = vmatmul.mubr.msk.f32.gmra.mrb[6].mxu1 %vm359_vm0, %v572_v37  ;;  %1033 = vmatmul.mubr.msk.f32.vlgmr.msra.gmra.mrb[8].mxu0 %vm359_vm0, %v506_v40 }
 0x25e   : > { %1050 = vmatprep.mubr.msk.f32.mxu1 %vm359_vm0, %v601_v39 }
 0x260   : > { %v602_v41 = vpop.trf.xlu1  ;;  %v507_v42 = vpop.trf.xlu0 }
 0x261   : > { %1051 = vmatmul.mubr.msk.f32.gmra.mrb[8].mxu1 %vm359_vm0, %v602_v41  ;;  %1035 = vmatprep.mubr.msk.f32.mxu0 %vm359_vm0, %v507_v42 }
 0x264   : > { %v603_v43 = vpop.trf.xlu1  ;;  %v508_v44 = vpop.trf.xlu0 }
 0x265   : > { %1053 = vmatprep.mubr.msk.f32.mxu1 %vm359_vm0, %v603_v43  ;;  %1036 = vmatmul.mubr.msk.f32.gmra.mrb[10].mxu0 %vm359_vm0, %v508_v44 }
 0x268   : > { %v604_v45 = vpop.trf.xlu1 }
 0x269   : > { %1054 = vmatmul.mubr.msk.f32.gmra.mrb[10].mxu1 %vm359_vm0, %v604_v45 }
 0x320   : > { %v1040_v46 = vpop.f32.mrb[0].mxu1 }
 0x321   : > { %818 = vst.msk [vmem:[%s1542_s20 + $0x28] sm:$0xff] %vm812_vm1, %v1040_v46  ;;  %v753_v47 = vpop.f32.mrb[1].mxu1 }
 0x322   : > { %817 = vst.msk [vmem:[%s1542_s20 + $0x20] sm:$0xff] %vm812_vm1, %v753_v47 }
 0x328   : > { %v1043_v48 = vpop.f32.mrb[2].mxu1 }
 0x329   : > { %820 = vst.msk [vmem:[%s1542_s20 + $0x38] sm:$0xff] %vm812_vm1, %v1043_v48  ;;  %v763_v49 = vpop.f32.mrb[3].mxu1 }
 0x32a   : > { %819 = vst.msk [vmem:[%s1542_s20 + $0x30] sm:$0xff] %vm812_vm1, %v763_v49 }
 0x32c   : > { %v1046_v50 = vpop.f32.mrb[4].mxu1 }
 0x32d   : > { %822 = vst.msk [vmem:[%s1542_s20 + $0x48] sm:$0xff] %vm812_vm1, %v1046_v50  ;;  %v773_v51 = vpop.f32.mrb[5].mxu1 }
 0x32e   : > { %821 = vst.msk [vmem:[%s1542_s20 + $0x40] sm:$0xff] %vm812_vm1, %v773_v51 }
 0x330   : > { %v1049_v52 = vpop.f32.mrb[6].mxu1  ;;  %v1034_v53 = vpop.f32.mrb[8].mxu0 }
 0x331   : > { %824 = vst.msk [vmem:[%s1542_s20 + $0x58] sm:$0xff] %vm812_vm1, %v1049_v52  ;;  %v783_v54 = vpop.f32.mrb[7].mxu1  ;;  %814 = vst.msk [vmem:[%s1542_s20 + $0x8] sm:$0xff] %vm812_vm1, %v1034_v53  ;;  %v733_v55 = vpop.f32.mrb[9].mxu0 }
 0x332   : > { %823 = vst.msk [vmem:[%s1542_s20 + $0x50] sm:$0xff] %vm812_vm1, %v783_v54  ;;  %813 = vst.msk [vmem:[%s1542_s20] sm:$0xff] %vm812_vm1, %v733_v55 }
 0x334   : > { %v1052_v56 = vpop.f32.mrb[8].mxu1 }
 0x335   : > { %826 = vst.msk [vmem:[%s1542_s20 + $0x68] sm:$0xff] %vm812_vm1, %v1052_v56  ;;  %v793_v57 = vpop.f32.mrb[9].mxu1 }
 0x336   : > { %825 = vst.msk [vmem:[%s1542_s20 + $0x60] sm:$0xff] %vm812_vm1, %v793_v57 }
 0x338   : > { %v1037_v58 = vpop.f32.mrb[10].mxu0 }
 0x339   : > { %816 = vst.msk [vmem:[%s1542_s20 + $0x18] sm:$0xff] %vm812_vm1, %v1037_v58  ;;  %v743_v59 = vpop.f32.mrb[11].mxu0 }
 0x33a   : > { %815 = vst.msk [vmem:[%s1542_s20 + $0x10] sm:$0xff] %vm812_vm1, %v743_v59 }
 0x33c   : > { %v1055_v60 = vpop.f32.mrb[10].mxu1 }
 0x33d   : > { %828 = vst.msk [vmem:[%s1542_s20 + $0x78] sm:$0xff] %vm812_vm1, %v1055_v60  ;;  %v803_v61 = vpop.f32.mrb[11].mxu1 }
 0x33e   : > { %827 = vst.msk [vmem:[%s1542_s20 + $0x70] sm:$0xff] %vm812_vm1, %v803_v61 }
 0x33f   : > { %1237 = shalt.err (!%p1234_p1)
}
 0x340   : > { %s1238_s17 = scalar_lea.hbm %s1577_s28, 2048  ;;  %s1242_s30 = scalar_lea.hbm %s1630_s3, 4096 }
 0x341   : > { %p1239_p13 = scmp.ne.s32.totalorder %s1577_s28, %s1238_s17  ;;  %p1243_p4 = scmp.lt.u32.totalorder %s1577_s28, %s1630_s3 }
 0x342   : > { %p1244_p5 = scmp.lt.u32.totalorder %s1242_s30, %s1238_s17  ;;  %p1246_p8 = scmp.lt.u32.totalorder %s1238_s17, %s1577_s28 }
 0x343   : > { %p1240_p6 = pnand %p1239_p13, %p1644_p0 }
 0x344   : > { %p1245_p11 = por %p1244_p5, %p1243_p4 }
 0x345   : > { %p1241_p10 = pneg %p1240_p6 }
 0x346   : > { %p1247_p2 = por %p1246_p8, %p1245_p11 }
 0x348   : > { %p1248_p3 = pnand %p1247_p2, %p1241_p10 }
 0x34a   : > { %1251 = shalt.err (!%p1248_p3)
}
 0x34b   : > { %s1302_s18 = smov 128   ;;  %s1303_s20 = smov 8  }
 0x34c   : > { %1076 = dma.vmem_to_hbm [thread:$0]  (%p1644_p0), %s1579_s8, 2048, %s1577_s28, %s830_s16, %s1302_s18, %s1302_s18, %s1303_s20  }
 0x34d PF: > { %s859_s7 = sand.u32 1, %s1282_s12   ;;  %p1645_p7 = scmp.ne.s32.totalorder %s1635_s19, 0 }
 0x34e   : > { %p1646_p9 = scmp.ge.s32.totalorder %s1294_s15, 2  ;;  %s860_s24 = scalar_lea.sflag [#allocation4], %s859_s7 }
 0x350   : > { %p1090_p12 = pnand %p1646_p9, %p1645_p7 }
 0x352   : > { %1277 = dma.done.wait (!%p1090_p12), %s860_s24, 2048  }
 0x353   : > { %1279 = vsyncadd (!%p1090_p12), %s860_s24, 4294965248  ;;  %p17_p1 = scmp.ge.s32.totalorder %s1440_s23, 4   ;;  %s1647_s12 = smov %s1286_s13 }
 0x354   : > { %s1648_s13 = smov %s1290_s14  ;;  %s1649_s14 = smov %s1456_s9 }
 0x355   : > { %s1650_s15 = smov %s1440_s23  ;;  %19 = sbr.rel (!%p17_p1) target bundleno = 6 (0x6), region = 85 }
 0x35c   :  { %865 = vsyncpa [#allocation3], 1 }
 0x35d   :  { %867 = vsyncpa [#allocation3 + $0x1], 1 }
 0x35e   :  { %868 = vsyncpa [#allocation6], 1 }
 0x35f   :  { %869 = vsyncpa [#allocation4], 1 }
 0x360   :  { %871 = vsyncpa [#allocation4 + $0x1], 1 }

</bundles_post_ra>
